<compile_context>
chip_gen: v6e
topology: v6e:2x2x1
jax: 0.10.0
libtpu: 0.0.40
codegen_flags: <defaults>
</compile_context>

<pallas_src>
import functools

import jax
import jax.numpy as jnp
from jax import lax
from jax.experimental import pallas as pl
from jax.experimental.pallas import tpu as pltpu


def _round_up(x, m):
    return ((x + m - 1) // m) * m


def aggr_sum_kernel(x_ref, h_ref, out_ref, *, matmul_dtype):
    # x_ref:   (Np // tn, tn) int32 -- all node ids, VMEM-resident for the
    #                                  whole grid (constant index_map).
    # h_ref:   (tn, tf)             -- feature tile of H (bf16 or f32).
    # out_ref: (tv, tf) f32         -- output tile, resident across the N axis.
    k = pl.program_id(2)

    @pl.when(k == 0)
    def _():
        out_ref[...] = jnp.zeros_like(out_ref)

    tv = out_ref.shape[0]
    v_start = pl.program_id(0) * tv

    # Node ids of this message tile, shifted so they are relative to this
    # V tile's first row.  Only the compare + cast are (tv, tn)-sized.
    x_tile = x_ref[pl.ds(k, 1), :] - v_start                  # (1, tn) int32
    row_iota = lax.broadcasted_iota(jnp.int32, (tv, 1), 0)    # (tv, 1) int32
    mask = (x_tile == row_iota).astype(matmul_dtype)          # (tv, tn)

    h = h_ref[...]
    if h.dtype != matmul_dtype:          # static (trace-time) decision
        h = h.astype(matmul_dtype)

    # Hot path: mask @ H on the MXU, f32 accumulation directly into out_ref.
    out_ref[...] += jnp.dot(mask, h, preferred_element_type=jnp.float32)


def aggr_sum(H, X_node, node_num, *, tv=512, tf=256, tn=2048,
             compute_dtype=jnp.bfloat16):
    """Pallas equivalent of AggrSum(node_num).forward(H, X_node).

    compute_dtype=jnp.bfloat16 (default): bf16 MXU path, f32 accumulation.
    compute_dtype=jnp.float32: keep H in f32 (matches PyTorch f32 semantics,
    up to the MXU's default f32 precision mode and summation order).
    """
    N, F = H.shape
    V = int(node_num)
    matmul_dtype = jnp.dtype(compute_dtype)

    # Hardware-aligned tile sizes, clamped to the (rounded-up) problem size.
    # Lane-dense 128-multiples for F and N, 16-multiple (bf16 sublane pack)
    # for V.
    tf = max(128, min(_round_up(tf, 128), _round_up(F, 128)))
    tn = max(128, min(_round_up(tn, 128), _round_up(N, 128)))
    tv = max(16, min(_round_up(tv, 16), _round_up(V, 16)))

    Vp = _round_up(V, tv)
    Fp = _round_up(F, tf)
    Np = _round_up(N, tn)

    # Megacore (v7x): keep at least 2 "parallel" grid tiles when the problem
    # is big enough, otherwise one TensorCore sits idle.
    if Vp // tv == 1 and Fp // tf == 1 and Vp >= 32:
        tv = _round_up((Vp + 1) // 2, 16)
        Vp = _round_up(V, tv)

    n_vtiles = Vp // tv

    # H is read from HBM once per V tile.  A wrapper-side cast costs an extra
    # ~6 B/elem pass (read f32 + write bf16); the in-kernel per-tile cast
    # costs +2 B/elem of HBM read per V tile.  Pre-cast only when it pays off.
    pre_cast = (H.dtype != matmul_dtype) and (n_vtiles > 2)
    Hp = H.astype(matmul_dtype) if pre_cast else H
    if (Np != N) or (Fp != F):
        Hp = jnp.pad(Hp, ((0, Np - N), (0, Fp - F)))

    # Pad X_node with -1: (x - v_start) is then < 0 and never matches the
    # non-negative row iota, so padded messages contribute nothing.
    xp = X_node.astype(jnp.int32)
    if Np != N:
        xp = jnp.pad(xp, (0, Np - N), constant_values=-1)
    xp = xp.reshape(Np // tn, tn)

    kernel = functools.partial(aggr_sum_kernel, matmul_dtype=matmul_dtype)

    out = pl.pallas_call(
        kernel,
        out_shape=jax.ShapeDtypeStruct((Vp, Fp), jnp.float32),
        grid_spec=pltpu.PrefetchScalarGridSpec(
            num_scalar_prefetch=0,
            grid=(Vp // tv, Fp // tf, Np // tn),
            in_specs=[
                # All node ids: constant index_map -> single DMA, VMEM-resident
                # for the whole grid.
                pl.BlockSpec((Np // tn, tn), lambda i, j, k: (0, 0)),
                # H tile: depends only on (k, j) -> the H column slab is read
                # from HBM Vp//tv times in total.
                pl.BlockSpec((tn, tf), lambda i, j, k: (k, j)),
            ],
            out_specs=pl.BlockSpec((tv, tf), lambda i, j, k: (i, j)),
        ),
        compiler_params=pltpu.CompilerParams(
            dimension_semantics=("parallel", "parallel", "arbitrary"),
        ),
    )(xp, Hp)

    return out[:V, :F]


def _reference(H, X_node, V, compute_dtype):
    # Same construction as the PyTorch module, using the kernel's H precision.
    ids = jnp.arange(V, dtype=jnp.int32)
    ref_mask = (X_node[None, :] == ids[:, None]).astype(jnp.float32)
    return ref_mask @ H.astype(compute_dtype).astype(jnp.float32)


def _bf16_representable_normal(key, shape):
    # Round the test data to bf16-representable values so the check does not
    # depend on which precision mode the MXU / XLA pick for f32 matmuls.
    return jax.random.normal(key, shape, dtype=jnp.float32).astype(
        jnp.bfloat16).astype(jnp.float32)


if __name__ == "__main__":
    key = jax.random.PRNGKey(0)
    k_h1, k_i1, k_h2, k_i2, k_h3, k_i3 = jax.random.split(key, 6)

    # Check 1: exact f32 path, single grid point, N/F padding.
    V1, N1, F1 = 16, 32, 128
    H1 = _bf16_representable_normal(k_h1, (N1, F1))
    X1 = jax.random.randint(k_i1, (N1,), 0, V1, dtype=jnp.int32)
    out1 = jax.block_until_ready(
        aggr_sum(H1, X1, V1, compute_dtype=jnp.float32))
    ref1 = _reference(H1, X1, V1, jnp.float32)
    assert out1.shape == (V1, F1)
    assert jnp.allclose(out1, ref1, atol=1e-4, rtol=1e-4)

    # Check 2: default bf16 path, padding on V/F/N, megacore split to 2 V
    # tiles, N-axis accumulation, in-kernel per-tile cast (<= 2 V tiles).
    V2, N2, F2 = 20, 300, 256
    H2 = _bf16_representable_normal(k_h2, (N2, F2))
    X2 = jax.random.randint(k_i2, (N2,), 0, V2, dtype=jnp.int32)
    out2 = jax.block_until_ready(aggr_sum(H2, X2, V2, tn=128))
    ref2 = _reference(H2, X2, V2, jnp.bfloat16)
    assert out2.shape == (V2, F2)
    assert jnp.allclose(out2, ref2, atol=1e-4, rtol=1e-4)

    # Check 3: > 2 V tiles -> wrapper pre-casts H to bf16; multi-step N
    # accumulation; no padding needed for H.
    V3, N3, F3 = 200, 256, 128
    H3 = _bf16_representable_normal(k_h3, (N3, F3))
    X3 = jax.random.randint(k_i3, (N3,), 0, V3, dtype=jnp.int32)
    out3 = jax.block_until_ready(aggr_sum(H3, X3, V3, tv=64, tn=128))
    ref3 = _reference(H3, X3, V3, jnp.bfloat16)
    assert out3.shape == (V3, F3)
    assert jnp.allclose(out3, ref3, atol=1e-4, rtol=1e-4)

    print("KERNEL_OK")
</pallas_src>

<mosaic_0001>
module attributes {stable_mosaic.version = 11 : i64} {
  func.func @aggr_sum_kernel(%arg0: i32, %arg1: i32, %arg2: i32, %arg3: memref<1x128xi32, #tpu.memory_space<vmem>>, %arg4: memref<128x128xf32, #tpu.memory_space<vmem>>, %arg5: memref<16x128xf32, #tpu.memory_space<vmem>>) attributes {dimension_semantics = [#tpu.dimension_semantics<parallel>, #tpu.dimension_semantics<parallel>, #tpu.dimension_semantics<arbitrary>], iteration_bounds = array<i64: 1, 1, 1>, scalar_prefetch = 0 : i64, scratch_operands = 0 : i64, tpu.core_type = #tpu.core_type<tc>, window_params = [{pipeline_mode = #tpu.pipeline_mode<synchronous>, transform_indices = @transform_0, window_bounds = array<i64: 1, 128>}, {transform_indices = @transform_1, window_bounds = array<i64: 128, 128>}, {transform_indices = @transform_2, window_bounds = array<i64: 16, 128>}]} {
    %c0_i32 = arith.constant 0 : i32
    %0 = arith.cmpi eq, %arg2, %c0_i32 : i32
    %1 = arith.extui %0 : i1 to i32
    %c0_i32_0 = arith.constant 0 : i32
    %2 = arith.cmpi ne, %1, %c0_i32_0 : i32
    scf.if %2 {
      %cst_7 = arith.constant 0.000000e+00 : f32
      %19 = vector.broadcast %cst_7 : f32 to vector<16x128xf32>
      %c0_8 = arith.constant 0 : index
      %c0_9 = arith.constant 0 : index
      %20 = vector.load %arg5[%c0_8, %c0_9] : memref<16x128xf32, #tpu.memory_space<vmem>>, vector<16x128xf32>
      tpu.vector_store %arg5[%c0_8, %c0_9], %19 {strides = array<i32>} : memref<16x128xf32, #tpu.memory_space<vmem>>, vector<16x128xf32>,
    } else {
    }
    %c16_i32 = arith.constant 16 : i32
    %3 = arith.muli %arg0, %c16_i32 : i32
    %4 = arith.index_cast %arg2 : i32 to index
    %c0 = arith.constant 0 : index
    %5 = vector.load %arg3[%4, %c0] : memref<1x128xi32, #tpu.memory_space<vmem>>, vector<1x128xi32>
    %6 = vector.broadcast %3 : i32 to vector<1x128xi32>
    %7 = arith.subi %5, %6 : vector<1x128xi32>
    %8 = tpu.iota {dimensions = array<i32: 0>} : vector<16x1xi32>
    %9 = vector.broadcast %7 : vector<1x128xi32> to vector<16x128xi32>
    %10 = vector.broadcast %8 : vector<16x1xi32> to vector<16x128xi32>
    %11 = arith.cmpi eq, %9, %10 : vector<16x128xi32>
    %12 = arith.extui %11 : vector<16x128xi1> to vector<16x128xi32>
    %13 = arith.sitofp %12 : vector<16x128xi32> to vector<16x128xf32>
    %c0_1 = arith.constant 0 : index
    %c0_2 = arith.constant 0 : index
    %14 = vector.load %arg4[%c0_1, %c0_2] : memref<128x128xf32, #tpu.memory_space<vmem>>, vector<128x128xf32>
    %c0_3 = arith.constant 0 : index
    %c0_4 = arith.constant 0 : index
    %15 = vector.load %arg5[%c0_3, %c0_4] : memref<16x128xf32, #tpu.memory_space<vmem>>, vector<16x128xf32>
    %cst = arith.constant dense<0.000000e+00> : vector<16x128xf32>
    %16 = tpu.matmul %13, %14, %cst {dimension_numbers = #tpu.dot_dimension_numbers<[1], [0], [0], [1], [0, 0, 1, 1], [], []>} : vector<16x128xf32>, vector<128x128xf32>, vector<16x128xf32> -> vector<16x128xf32>
    %17 = arith.addf %15, %16 : vector<16x128xf32>
    %c0_5 = arith.constant 0 : index
    %c0_6 = arith.constant 0 : index
    %18 = vector.load %arg5[%c0_5, %c0_6] : memref<16x128xf32, #tpu.memory_space<vmem>>, vector<16x128xf32>
    tpu.vector_store %arg5[%c0_5, %c0_6], %17 {strides = array<i32>} : memref<16x128xf32, #tpu.memory_space<vmem>>, vector<16x128xf32>,
    return
  }
  func.func @transform_0(%arg0: i32, %arg1: i32, %arg2: i32) -> (i32, i32) {
    %c0_i32 = arith.constant 0 : i32
    %c0_i32_0 = arith.constant 0 : i32
    %c0_i32_1 = arith.constant 0 : i32
    return %c0_i32, %c0_i32_0 : i32, i32
  }
  func.func @transform_1(%arg0: i32, %arg1: i32, %arg2: i32) -> (i32, i32) {
    %c0_i32 = arith.constant 0 : i32
    return %arg2, %arg1 : i32, i32
  }
  func.func @transform_2(%arg0: i32, %arg1: i32, %arg2: i32) -> (i32, i32) {
    %c0_i32 = arith.constant 0 : i32
    return %arg0, %arg1 : i32, i32
  }
}

</mosaic_0001>

<bundles_post_ra>
// kernel: tpu_custom_call.1
= control target key start
LH: loop header
LB: loop body
LE: loop exit
PB: predicated region body
PF: predicated region fallthrough
CT: control target
= control target key end

     0   :  { %7 = vsyncpa [#allocation3], 0  ;;  %s343_s0 = inlined_call_operand.hbm [shape: s32[1,128], index: 0, kind: input, shape index: {}]   ;;  %s344_s1 = inlined_call_operand.hbm [shape: f32[128,128], index: 1, kind: input, shape index: {}]   ;;  %s345_s2 = inlined_call_operand.hbm [shape: f32[16,128], index: 2, kind: output, shape index: {}]  }
   0x1   :  { %8 = vsyncpa [#allocation6], 0 }
   0x2   :  { %9 = vsyncpa [#allocation4], 0  ;;  %s307_s9 = smov [#allocation2]   ;;  %s308_s11 = smov [#allocation5]  }
   0x3   :  { %s16_s10 = sshll.u32 %s307_s9, 4  ;;  %s25_s12 = sshll.u32 %s308_s11, 4  ;;  %s17_s10 = int_to_ptr.vmem [resolvable:$true] %s16_s10  ;;  %s26_s12 = int_to_ptr.vmem [resolvable:$true] %s25_s12 }
   0x4   :  { %s249_s13 = scalar_lea.vmem %s17_s10, 16  ;;  %s253_s14 = scalar_lea.vmem %s17_s10, 32 }
   0x5   :  { %p250_p0 = scmp.ne.s32.totalorder %s17_s10, %s249_s13  ;;  %p254_p1 = scmp.lt.s32.totalorder %s17_s10, %s17_s10 }
   0x6   :  { %p255_p2 = scmp.lt.s32.totalorder %s253_s14, %s249_s13 }
   0x8   :  { %p256_p3 = por %p255_p2, %p254_p1 }
   0xa   :  { %p257_p4 = pnand %p256_p3, %p250_p0 }
   0xc   :  { %260 = shalt.err (!%p257_p4)
}
   0xd   :  { %19 = dma.hbm_to_vmem [thread:$0]  %s343_s0, 16, %s17_s10, [#allocation3]  }
   0xe   :  { %s269_s17 = scalar_lea.vmem %s26_s12, 2048  ;;  %p274_p6 = scmp.lt.s32.totalorder %s26_s12, %s26_s12 }
   0xf   :  { %p270_p5 = scmp.ne.s32.totalorder %s26_s12, %s269_s17  ;;  %p275_p7 = scmp.lt.s32.totalorder %s269_s17, %s269_s17 }
  0x11   :  { %p276_p8 = por %p275_p7, %p274_p6 }
  0x13   :  { %p277_p9 = pnand %p276_p8, %p270_p5 }
  0x15   :  { %280 = shalt.err (!%p277_p9)
}
  0x16   :  { %s309_s18 = smov 128   ;;  %s310_s19 = smov 8  }
  0x17   :  { %31 = dma.hbm_to_vmem [thread:$0]  %s344_s1, 2048, %s26_s12, [#allocation6], %s309_s18, %s309_s18, %s310_s19  }
  0x18   :  { %301 = dma.done.wait [#allocation3], 16  }
  0x19   :  { %302 = vsyncadd [#allocation3], 4294967280 }
  0x1a   :  { %303 = dma.done.wait [#allocation6], 2048  }
  0x1b   :  { %304 = vsyncadd [#allocation6], 4294965248  ;;  %v48_v0 = vlaneseq  ;;  %v76_v1 = vld [vmem:[#allocation5 + $0x78] sm:$0xff]  ;;  %v75_v2 = vld [vmem:[#allocation5 + $0x70] sm:$0xff]  ;;  %v311_v8 = vmov 1.0   ;;  %s312_s0 = smov [#allocation7]  }
  0x1c   :  { %199 = vmatprep.subr.mxu0 %v76_v1  ;;  %v74_v3 = vld [vmem:[#allocation5 + $0x68] sm:$0xff]  ;;  %v73_v5 = vld [vmem:[#allocation5 + $0x60] sm:$0xff]  ;;  %v176_v6 = vld [vmem:[#allocation2] ss:$0 sm:$0xff]  ;;  %s163_s1 = sshll.u32 %s312_s0, 4  ;;  %s164_s1 = int_to_ptr.vmem [resolvable:$true] %s163_s1 }
  0x1d   :  { %200 = vmatpush3.msra.mxu0 %v76_v1  ;;  %v49_v4 = vshrl.u32 %v48_v0, 7  ;;  %v72_v7 = vld [vmem:[#allocation5 + $0x58] sm:$0xff]  ;;  %v71_v9 = vld [vmem:[#allocation5 + $0x50] sm:$0xff]  ;;  %v70_v10 = vld [vmem:[#allocation5 + $0x48] sm:$0xff]  ;;  %s281_s22 = scalar_lea.vmem %s164_s1, 256  ;;  %p286_p11 = scmp.lt.s32.totalorder %s164_s1, %s164_s1 }
  0x1e   :  { %201 = vmatprep.subr.mxu0 %v75_v2  ;;  %v69_v11 = vld [vmem:[#allocation5 + $0x40] sm:$0xff]  ;;  %v68_v12 = vld [vmem:[#allocation5 + $0x38] sm:$0xff]  ;;  %v67_v13 = vld [vmem:[#allocation5 + $0x30] sm:$0xff]  ;;  %p282_p10 = scmp.ne.s32.totalorder %s164_s1, %s281_s22  ;;  %p287_p12 = scmp.lt.s32.totalorder %s281_s22, %s281_s22 }
  0x1f   :  { %202 = vmatpush3.msra.mxu0 %v75_v2  ;;  %vm55_vm0 = vcmp.eq.s32.totalorder %v176_v6, %v49_v4  ;;  %v66_v14 = vld [vmem:[#allocation5 + $0x28] sm:$0xff]  ;;  %v65_v15 = vld [vmem:[#allocation5 + $0x20] sm:$0xff]  ;;  %v64_v16 = vld [vmem:[#allocation5 + $0x18] sm:$0xff]  ;;  %v50_v19 = vadd.s32 8, %v49_v4 }
  0x20   :  { %203 = vmatprep.subr.mxu0 %v74_v3  ;;  %231 = vmatprep.mubr.msk.f32.mxu0 %vm55_vm0, %v311_v8  ;;  %v63_v17 = vld [vmem:[#allocation5 + $0x10] sm:$0xff]  ;;  %v62_v18 = vld [vmem:[#allocation5 + $0x8] sm:$0xff]  ;;  %v61_v20 = vld [vmem:[#allocation5] sm:$0xff]  ;;  %p288_p13 = por %p287_p12, %p286_p11 }
  0x21   :  { %204 = vmatpush3.msra.mxu0 %v74_v3  ;;  %vm56_vm1 = vcmp.eq.s32.totalorder %v176_v6, %v50_v19 }
  0x22   :  { %205 = vmatprep.subr.mxu0 %v73_v5  ;;  %p289_p0 = pnand %p288_p13, %p282_p10 }
  0x23   :  { %206 = vmatpush3.msra.mxu0 %v73_v5 }
  0x24   :  { %207 = vmatprep.subr.mxu0 %v72_v7 }
  0x25   :  { %208 = vmatpush3.msra.mxu0 %v72_v7 }
  0x26   :  { %209 = vmatprep.subr.mxu0 %v71_v9 }
  0x27   :  { %210 = vmatpush3.msra.mxu0 %v71_v9 }
  0x28   :  { %211 = vmatprep.subr.mxu0 %v70_v10 }
  0x29   :  { %212 = vmatpush3.msra.mxu0 %v70_v10 }
  0x2a   :  { %213 = vmatprep.subr.mxu0 %v69_v11 }
  0x2b   :  { %214 = vmatpush3.msra.mxu0 %v69_v11 }
  0x2c   :  { %215 = vmatprep.subr.mxu0 %v68_v12 }
  0x2d   :  { %216 = vmatpush3.msra.mxu0 %v68_v12 }
  0x2e   :  { %217 = vmatprep.subr.mxu0 %v67_v13 }
  0x2f   :  { %218 = vmatpush3.msra.mxu0 %v67_v13 }
  0x30   :  { %219 = vmatprep.subr.mxu0 %v66_v14 }
  0x31   :  { %220 = vmatpush3.msra.mxu0 %v66_v14 }
  0x32   :  { %221 = vmatprep.subr.mxu0 %v65_v15 }
  0x33   :  { %222 = vmatpush3.msra.mxu0 %v65_v15 }
  0x34   :  { %223 = vmatprep.subr.mxu0 %v64_v16 }
  0x35   :  { %224 = vmatpush3.msra.mxu0 %v64_v16 }
  0x36   :  { %225 = vmatprep.subr.mxu0 %v63_v17 }
  0x37   :  { %226 = vmatpush3.msra.mxu0 %v63_v17 }
  0x38   :  { %227 = vmatprep.subr.mxu0 %v62_v18 }
  0x39   :  { %228 = vmatpush3.msra.mxu0 %v62_v18 }
  0x3a   :  { %229 = vmatprep.subr.mxu0 %v61_v20 }
  0x3b   :  { %230 = vmatpush3.msra.mxu0 %v61_v20 }
  0x3c   :  { %232 = vmatmul.mubr.msk.f32.vlgmr.msra.gmra.mxu0 %vm56_vm1, %v311_v8 }
  0xfc   :  { %v233_v21 = vpop.f32.mrf.mxu0 }
  0xfd   :  { %157 = vst [vmem:[#allocation7 + $0x8] sm:$0xff] %v233_v21 }
  0xfe   :  { %v145_v22 = vpop.f32.mrf.mxu0 }
  0xff   :  { %156 = vst [vmem:[#allocation7] sm:$0xff] %v145_v22 }
 0x100   :  { %292 = shalt.err (!%p289_p0)
}
 0x101   :  { %169 = dma.vmem_to_hbm [thread:$0]  %s164_s1, 256, %s345_s2, [#allocation4], %s309_s18, %s309_s18, %s310_s19  }
 0x102   :  { %305 = dma.done.wait [#allocation4], 256  }
 0x103   :  { %306 = vsyncadd [#allocation4], 4294967040 }
 0x104   :  { %173 = vsyncpa [#allocation3], 1 }
 0x105   :  { %174 = vsyncpa [#allocation6], 1 }
 0x106   :  { %175 = vsyncpa [#allocation4], 1 }

</bundles_post_ra>
